<compile_context>
chip_gen: v7x
topology: tpu7x:2x2x1
jax: 0.10.0
libtpu: 0.0.40
codegen_flags: <defaults>
</compile_context>

<pallas_src>
import jax
import jax.numpy as jnp
from jax import lax
from jax.experimental import pallas as pl
from jax.experimental.pallas import tpu as pltpu

LANE = 128
CHUNK_ROWS = 512  # rows processed per in-block chunk (bounds f32 temporaries to ~256 KiB)


def _round_up(x, m):
    return ((x + m - 1) // m) * m


def _device_defaults():
    """(cores, target_block_bytes) chosen per TPU generation; conservative fallback."""
    try:
        kind = jax.devices()[0].device_kind.lower()
    except Exception:
        kind = ""
    if "v7" in kind:
        # 2 TensorCores/chip; 64 MiB physical VMEM (32 MiB scoped default) -> 4 MiB blocks:
        # 2 inputs x 2 buffers x 4 MiB = 16 MiB + small scratch, well inside budget.
        return 2, 4 * 1024 * 1024
    if "v6" in kind:
        # Single TC, 32 MiB scoped-VMEM default.
        return 1, 4 * 1024 * 1024
    # v5e / unknown: 16 MiB scoped-VMEM default -> 2 MiB blocks (8 MiB double-buffered).
    return 1, 2 * 1024 * 1024


def _make_mse_kernel(steps_per_core, rows, need_mask, chunk):
    """Kernel factory.  Statics: steps_per_core, rows (valid row count), need_mask
    (grid row coverage != rows), chunk (sub-chunk row count)."""

    def partial_sum(xc, tc, row0):
        # xc/tc: (r, LANE) chunk already loaded; row0: global row index of xc[0].
        d = xc.astype(jnp.float32) - tc.astype(jnp.float32)
        sq = d * d
        r = sq.shape[0]
        if need_mask:
            rid = row0 + lax.broadcasted_iota(jnp.int32, (r, LANE), 0)
            sq = jnp.where(rid < rows, sq, 0.0)
        if r % 8 == 0:
            # Vreg-shaped tree reduction: (r,128)->(r//8,8,128)->sum axis 0 (pure VPU adds,
            # no cross-lane reduce, no masked scalar store).
            return jnp.sum(sq.reshape(r // 8, 8, LANE), axis=0)
        # Tiny-slab fallback (whole array has < 8 rows): put column sums into sublane 0.
        s = jnp.sum(sq, axis=0, keepdims=True)                        # (1, LANE)
        is_row0 = lax.broadcasted_iota(jnp.int32, (8, LANE), 0) == 0
        return jnp.where(is_row0, jnp.broadcast_to(s, (8, LANE)), 0.0)

    def kernel(x_ref, t_ref, acc_ref):
        step = pl.program_id(1)

        @pl.when(step == 0)
        def _init():
            acc_ref[...] = jnp.zeros_like(acc_ref)

        bm = x_ref.shape[0]
        # Unclamped logical row offset of this block (used for masking; over-covered blocks
        # get base_row >= rows and therefore contribute exactly 0).
        base_row = (pl.program_id(0) * steps_per_core + step) * bm

        n_full = bm // chunk
        rem = bm - n_full * chunk

        acc = jnp.zeros((8, LANE), jnp.float32)
        if n_full > 0:
            def body(j, a):
                r0 = pl.multiple_of(j * chunk, chunk)
                xc = x_ref[pl.ds(r0, chunk), :]
                tc = t_ref[pl.ds(r0, chunk), :]
                return a + partial_sum(xc, tc, base_row + r0)
            acc = lax.fori_loop(0, n_full, body, acc, unroll=True)
        if rem > 0:
            r0 = n_full * chunk
            xc = x_ref[pl.ds(r0, rem), :]
            tc = t_ref[pl.ds(r0, rem), :]
            acc = acc + partial_sum(xc, tc, base_row + r0)

        acc_ref[...] += acc

    return kernel


def content_loss_forward(x, target, *, block_rows=None, num_cores=None):
    """Returns (input_passthrough, mse_loss_scalar), matching ContentLoss.forward."""
    assert x.shape == target.shape, "input/target shape mismatch"
    total = x.size
    itemsize = jnp.dtype(x.dtype).itemsize

    auto_cores, tgt_block_bytes = _device_defaults()
    if num_cores is None:
        num_cores = auto_cores
    if block_rows is None:
        # bf16 inputs automatically get 2x the rows -> same bytes per DMA step.
        block_rows = max(8, tgt_block_bytes // (LANE * itemsize))

    # Lane-dense (rows, LANE) view.  Pure reshape (free) when total % 128 == 0.  Ragged totals
    # need a minimal pad to the next lane multiple (unavoidable for the reshape); no padding
    # up to block multiples ever happens — tails are masked in-kernel instead.
    xf = x.reshape(-1)
    tf = target.reshape(-1)
    tail = total % LANE
    if tail:
        xf = jnp.pad(xf, (0, LANE - tail))
        tf = jnp.pad(tf, (0, LANE - tail))
    rows = xf.size // LANE
    xf = xf.reshape(rows, LANE)
    tf = tf.reshape(rows, LANE)

    # Grid sizing.
    cores = min(num_cores, rows // 8) if rows >= 8 else 1
    cores = max(cores, 1)
    if rows < 8:
        bm = rows  # block dim == full array dim (allowed even when not a multiple of 8)
    else:
        bm = min(block_rows, _round_up(pl.cdiv(rows, cores), 8), (rows // 8) * 8)
    num_blocks = pl.cdiv(rows, bm)
    steps_per_core = pl.cdiv(num_blocks, cores)
    need_mask = (cores * steps_per_core * bm) != rows

    if need_mask:
        last_block = num_blocks - 1

        def in_map(c, i):
            # Clamp so the DMA window always stays inside the array; blocks past the end are
            # fully masked out in-kernel (base_row >= rows), so their contents don't matter.
            return (jnp.minimum(c * steps_per_core + i, last_block), 0)
    else:
        def in_map(c, i):
            return (c * steps_per_core + i, 0)

    cost = pl.CostEstimate(
        flops=3 * rows * LANE,  # sub, mul, add per streamed element
        transcendentals=0,
        bytes_accessed=2 * rows * LANE * itemsize + cores * 8 * LANE * 4,
    )

    kernel = _make_mse_kernel(steps_per_core, rows, need_mask, CHUNK_ROWS)

    partials = pl.pallas_call(
        kernel,
        out_shape=jax.ShapeDtypeStruct((cores, 8, LANE), jnp.float32),
        grid_spec=pltpu.PrefetchScalarGridSpec(
            num_scalar_prefetch=0,
            grid=(cores, steps_per_core),
            in_specs=[
                pl.BlockSpec((bm, LANE), in_map),
                pl.BlockSpec((bm, LANE), in_map),
            ],
            # Each core owns its own (8,128) partial-sum block -> no cross-core race.
            out_specs=pl.BlockSpec((None, 8, LANE), lambda c, i: (c, 0, 0)),
        ),
        # NOTE: if an xprof trace on v7x shows the leading axis running sequentially, switch
        # that axis to pltpu.CORE_PARALLEL (core-level semantics are what change codegen).
        compiler_params=pltpu.CompilerParams(
            dimension_semantics=("parallel", "arbitrary"),
        ),
        cost_estimate=cost,
    )(xf, tf)

    loss = jnp.sum(partials) * (1.0 / float(total))
    return x, loss


if __name__ == "__main__":
    key = jax.random.PRNGKey(0)
    kx, kt = jax.random.split(key)

    # Small NCHW shapes consistent with a conv-feature-map input.
    N, C, H, W = 2, 4, 16, 16
    x = jax.random.normal(kx, (N, C, H, W), dtype=jnp.float32)
    # "target" is the fixed (detached) feature map, built deterministically in-script.
    target = jax.random.normal(kt, (N, C, H, W), dtype=jnp.float32)

    out, loss = content_loss_forward(x, target)
    out = jax.block_until_ready(out)
    loss = jax.block_until_ready(loss)
    ref_loss = jnp.mean((x - target) ** 2)
    assert jnp.allclose(loss, ref_loss, rtol=1e-5, atol=1e-6), (loss, ref_loss)
    assert jnp.array_equal(out, x)

    # Ragged case: element count NOT a multiple of 128 (exercises tiny-slab fallback path).
    k2x, k2t = jax.random.split(jax.random.PRNGKey(1))
    x2 = jax.random.normal(k2x, (2, 3, 7, 5), dtype=jnp.float32)
    t2 = jax.random.normal(k2t, (2, 3, 7, 5), dtype=jnp.float32)
    out2, loss2 = content_loss_forward(x2, t2)
    loss2 = jax.block_until_ready(loss2)
    ref_loss2 = jnp.mean((x2 - t2) ** 2)
    assert jnp.allclose(loss2, ref_loss2, rtol=1e-5, atol=1e-6), (loss2, ref_loss2)
    assert jnp.array_equal(out2, x2)

    # Moderate case with forced small blocks + 2-way core axis: exercises the multi-step grid,
    # chunked fori_loop accumulation, clamped index_map and row-tail masking on any chip.
    k3x, k3t = jax.random.split(jax.random.PRNGKey(2))
    x3 = jax.random.normal(k3x, (2, 8, 96, 96), dtype=jnp.float32)   # 147456 elems = 1152 rows
    t3 = jax.random.normal(k3t, (2, 8, 96, 96), dtype=jnp.float32)
    out3, loss3 = content_loss_forward(x3, t3, block_rows=512, num_cores=2)
    loss3 = jax.block_until_ready(loss3)
    ref_loss3 = jnp.mean((x3 - t3) ** 2)
    assert jnp.allclose(loss3, ref_loss3, rtol=1e-5, atol=1e-6), (loss3, ref_loss3)
    assert jnp.array_equal(out3, x3)

    print("KERNEL_OK")
</pallas_src>

<mosaic_0001>
module attributes {stable_mosaic.version = 11 : i64} {
  func.func @kernel(%arg0: i32, %arg1: i32, %arg2: memref<16x128xf32, #tpu.memory_space<vmem>>, %arg3: memref<16x128xf32, #tpu.memory_space<vmem>>, %arg4: memref<1x8x128xf32, #tpu.memory_space<vmem>>) attributes {dimension_semantics = [#tpu.dimension_semantics<parallel>, #tpu.dimension_semantics<arbitrary>], iteration_bounds = array<i64: 1, 1>, scalar_prefetch = 0 : i64, scratch_operands = 0 : i64, tpu.core_type = #tpu.core_type<tc>, window_params = [{transform_indices = @transform_0, window_bounds = array<i64: 16, 128>}, {transform_indices = @transform_1, window_bounds = array<i64: 16, 128>}, {transform_indices = @transform_2, window_bounds = array<i64: 1, 8, 128>}]} {
    %c0_i32 = arith.constant 0 : i32
    %0 = arith.cmpi eq, %arg1, %c0_i32 : i32
    %1 = arith.extui %0 : i1 to i32
    %c0_i32_0 = arith.constant 0 : i32
    %2 = arith.cmpi ne, %1, %c0_i32_0 : i32
    scf.if %2 {
      %cst_11 = arith.constant 0.000000e+00 : f32
      %17 = vector.broadcast %cst_11 : f32 to vector<8x128xf32>
      %c0_12 = arith.constant 0 : index
      %c0_13 = arith.constant 0 : index
      %c0_14 = arith.constant 0 : index
      %18 = vector.load %arg4[%c0_12, %c0_13, %c0_14] : memref<1x8x128xf32, #tpu.memory_space<vmem>>, vector<1x8x128xf32>
      %19 = vector.shape_cast %18 : vector<1x8x128xf32> to vector<8x128xf32>
      %20 = vector.shape_cast %17 : vector<8x128xf32> to vector<1x8x128xf32>
      tpu.vector_store %arg4[%c0_12, %c0_13, %c0_14], %20 {strides = array<i32>} : memref<1x8x128xf32, #tpu.memory_space<vmem>>, vector<1x8x128xf32>,
    } else {
    }
    %cst = arith.constant 0.000000e+00 : f32
    %3 = vector.broadcast %cst : f32 to vector<8x128xf32>
    %c0 = arith.constant 0 : index
    %c0_1 = arith.constant 0 : index
    %4 = vector.load %arg2[%c0, %c0_1] : memref<16x128xf32, #tpu.memory_space<vmem>>, vector<16x128xf32>
    %c0_2 = arith.constant 0 : index
    %c0_3 = arith.constant 0 : index
    %5 = vector.load %arg3[%c0_2, %c0_3] : memref<16x128xf32, #tpu.memory_space<vmem>>, vector<16x128xf32>
    %6 = arith.subf %4, %5 : vector<16x128xf32>
    %7 = arith.mulf %6, %6 : vector<16x128xf32>
    %8 = vector.shape_cast %7 : vector<16x128xf32> to vector<2x8x128xf32>
    %cst_4 = arith.constant dense<0.000000e+00> : vector<8x128xf32>
    %9 = vector.multi_reduction <add>, %8, %cst_4 [0] : vector<2x8x128xf32> to vector<8x128xf32>
    %10 = arith.addf %3, %9 : vector<8x128xf32>
    %c0_5 = arith.constant 0 : index
    %c0_6 = arith.constant 0 : index
    %c0_7 = arith.constant 0 : index
    %11 = vector.load %arg4[%c0_5, %c0_6, %c0_7] : memref<1x8x128xf32, #tpu.memory_space<vmem>>, vector<1x8x128xf32>
    %12 = vector.shape_cast %11 : vector<1x8x128xf32> to vector<8x128xf32>
    %13 = arith.addf %12, %10 : vector<8x128xf32>
    %c0_8 = arith.constant 0 : index
    %c0_9 = arith.constant 0 : index
    %c0_10 = arith.constant 0 : index
    %14 = vector.load %arg4[%c0_8, %c0_9, %c0_10] : memref<1x8x128xf32, #tpu.memory_space<vmem>>, vector<1x8x128xf32>
    %15 = vector.shape_cast %14 : vector<1x8x128xf32> to vector<8x128xf32>
    %16 = vector.shape_cast %13 : vector<8x128xf32> to vector<1x8x128xf32>
    tpu.vector_store %arg4[%c0_8, %c0_9, %c0_10], %16 {strides = array<i32>} : memref<1x8x128xf32, #tpu.memory_space<vmem>>, vector<1x8x128xf32>,
    return
  }
  func.func @transform_0(%arg0: i32, %arg1: i32) -> (i32, i32) {
    %c1_i32 = arith.constant 1 : i32
    %0 = arith.muli %arg0, %c1_i32 : i32
    %1 = arith.addi %0, %arg1 : i32
    %c0_i32 = arith.constant 0 : i32
    %c0_i32_0 = arith.constant 0 : i32
    return %1, %c0_i32 : i32, i32
  }
  func.func @transform_1(%arg0: i32, %arg1: i32) -> (i32, i32) {
    %c1_i32 = arith.constant 1 : i32
    %0 = arith.muli %arg0, %c1_i32 : i32
    %1 = arith.addi %0, %arg1 : i32
    %c0_i32 = arith.constant 0 : i32
    %c0_i32_0 = arith.constant 0 : i32
    return %1, %c0_i32 : i32, i32
  }
  func.func @transform_2(%arg0: i32, %arg1: i32) -> (i32, i32, i32) {
    %c0_i32 = arith.constant 0 : i32
    %c0_i32_0 = arith.constant 0 : i32
    %c0_i32_1 = arith.constant 0 : i32
    return %arg0, %c0_i32, %c0_i32_0 : i32, i32, i32
  }
}

</mosaic_0001>

<bundles_post_ra>
// kernel: tpu_custom_call.1
= control target key start
LH: loop header
LB: loop body
LE: loop exit
PB: predicated region body
PF: predicated region fallthrough
CT: control target
= control target key end

     0   :  { %7 = vsyncpa [#allocation3], 0  ;;  %s220_s0 = inlined_call_operand.hbm [shape: f32[16,128], index: 0, kind: input, shape index: {}]   ;;  %s221_s1 = inlined_call_operand.hbm [shape: f32[16,128], index: 1, kind: input, shape index: {}]   ;;  %s222_s2 = inlined_call_operand.hbm [shape: f32[1,8,128], index: 2, kind: output, shape index: {}]  }
   0x1   :  { %8 = vsyncpa [#allocation6], 0 }
   0x2   :  { %9 = vsyncpa [#allocation4], 0  ;;  %s164_s9 = smov [#allocation2]   ;;  %s92_s13 = scalar_lea.hbm %s220_s0, 256 }
   0x3   :  { %s19_s10 = sshll.u32 %s164_s9, 4  ;;  %p93_p0 = scmp.ne.s32.totalorder %s220_s0, %s92_s13  ;;  %s20_s10 = int_to_ptr.vmem [resolvable:$true] %s19_s10 }
   0x4   :  { %p96_p1 = scmp.lt.u32.totalorder %s92_s13, %s220_s0 }
   0x6   :  { %p98_p2 = pnand %p96_p1, %p93_p0 }
   0x8   :  { %101 = shalt.err (!%p98_p2)
}
   0x9   :  { %s102_s18 = scalar_lea.vmem %s20_s10, 256  ;;  %p107_p4 = scmp.lt.s32.totalorder %s20_s10, %s20_s10 }
   0xa   :  { %p103_p3 = scmp.ne.s32.totalorder %s20_s10, %s102_s18  ;;  %p108_p5 = scmp.lt.s32.totalorder %s102_s18, %s102_s18 }
   0xc   :  { %p109_p6 = por %p108_p5, %p107_p4 }
   0xe   :  { %p110_p7 = pnand %p109_p6, %p103_p3 }
  0x10   :  { %113 = shalt.err (!%p110_p7)
}
  0x11   :  { %s165_s19 = smov 128   ;;  %s166_s20 = smov 8  }
  0x12   :  { %25 = dma.hbm_to_vmem [thread:$0]  %s220_s0, 256, %s20_s10, [#allocation3], %s165_s19, %s165_s19, %s166_s20  }
  0x13   :  { %s167_s23 = smov [#allocation5]   ;;  %s114_s27 = scalar_lea.hbm %s221_s1, 256 }
  0x14   :  { %s35_s24 = sshll.u32 %s167_s23, 4  ;;  %p115_p8 = scmp.ne.s32.totalorder %s221_s1, %s114_s27  ;;  %s36_s24 = int_to_ptr.vmem [resolvable:$true] %s35_s24 }
  0x15   :  { %p118_p9 = scmp.lt.u32.totalorder %s114_s27, %s221_s1 }
  0x17   :  { %p120_p10 = pnand %p118_p9, %p115_p8 }
  0x19   :  { %123 = shalt.err (!%p120_p10)
}
  0x1a   :  { %s124_s4 = scalar_lea.vmem %s36_s24, 256  ;;  %p129_p12 = scmp.lt.s32.totalorder %s36_s24, %s36_s24 }
  0x1b   :  { %p125_p11 = scmp.ne.s32.totalorder %s36_s24, %s124_s4  ;;  %p130_p13 = scmp.lt.s32.totalorder %s124_s4, %s124_s4 }
  0x1d   :  { %p131_p0 = por %p130_p13, %p129_p12 }
  0x1f   :  { %p132_p1 = pnand %p131_p0, %p125_p11 }
  0x21   :  { %135 = shalt.err (!%p132_p1)
}
  0x22   :  { %41 = dma.hbm_to_vmem [thread:$0]  %s221_s1, 256, %s36_s24, [#allocation6], %s165_s19, %s165_s19, %s166_s20  }
  0x23   :  { %158 = dma.done.wait [#allocation3], 256  }
  0x24   :  { %159 = vsyncadd [#allocation3], 4294967040 }
  0x25   :  { %160 = dma.done.wait [#allocation6], 256  }
  0x26   :  { %161 = vsyncadd [#allocation6], 4294967040  ;;  %v57_v0 = vld [vmem:[#allocation2] sm:$0xff]  ;;  %v58_v1 = vld [vmem:[#allocation2 + $0x8] sm:$0xff]  ;;  %s168_s6 = smov [#allocation7]  }
  0x27   :  { %v59_v2 = vld [vmem:[#allocation5] sm:$0xff]  ;;  %v60_v3 = vld [vmem:[#allocation5 + $0x8] sm:$0xff]  ;;  %s76_s7 = sshll.u32 %s168_s6, 4  ;;  %s77_s7 = int_to_ptr.vmem [resolvable:$true] %s76_s7 }
  0x28   :  { %v61_v4 = vsub.f32 %v57_v0, %v59_v2  ;;  %v62_v5 = vsub.f32 %v58_v1, %v60_v3  ;;  %s136_s8 = scalar_lea.vmem %s77_s7, 128  ;;  %p141_p3 = scmp.lt.s32.totalorder %s77_s7, %s77_s7 }
  0x29   :  { %p137_p2 = scmp.ne.s32.totalorder %s77_s7, %s136_s8  ;;  %p142_p4 = scmp.lt.s32.totalorder %s136_s8, %s136_s8 }
  0x2a   :  { %v63_v6 = vmul.f32 %v61_v4, %v61_v4  ;;  %v64_v7 = vmul.f32 %v62_v5, %v62_v5 }
  0x2b   :  { %p143_p5 = por %p142_p4, %p141_p3 }
  0x2c   :  { %v65_v8 = vadd.f32 %v64_v7, %v63_v6 }
  0x2d   :  { %p144_p6 = pnand %p143_p5, %p137_p2 }
  0x2e   :  { %69 = vst [vmem:[#allocation7] sm:$0xff] %v65_v8 }
  0x2f   :  { %147 = shalt.err (!%p144_p6)
}
  0x30   :  { %s148_s10 = scalar_lea.hbm %s222_s2, 128 }
  0x31   :  { %p149_p7 = scmp.ne.s32.totalorder %s222_s2, %s148_s10  ;;  %p152_p8 = scmp.lt.u32.totalorder %s148_s10, %s222_s2 }
  0x33   :  { %p154_p9 = pnand %p152_p8, %p149_p7 }
  0x35   :  { %157 = shalt.err (!%p154_p9)
}
  0x36   :  { %79 = dma.vmem_to_hbm [thread:$0]  %s77_s7, 128, %s222_s2, [#allocation4]  }
  0x37   :  { %162 = dma.done.wait [#allocation4], 128  }
  0x38   :  { %163 = vsyncadd [#allocation4], 4294967168 }
  0x39   :  { %83 = vsyncpa [#allocation3], 1 }
  0x3a   :  { %84 = vsyncpa [#allocation6], 1 }
  0x3b   :  { %85 = vsyncpa [#allocation4], 1 }

</bundles_post_ra>
